<compile_context>
chip_gen: v5e
topology: v5e:2x2
jax: 0.10.0
libtpu: 0.0.40
codegen_flags: <defaults>
</compile_context>

<pallas_src>
import numpy as np
import jax
import jax.numpy as jnp
from jax.experimental import pallas as pl
from jax.experimental.pallas import tpu as pltpu


# ----------------------------- config (small) --------------------------------
SPHERE_CHANNELS = 16      # sphere_channels
M_OUTPUT_CHANNELS = 16    # m_output_channels
LMAX = 2
MMAX = 2
BATCH = 200               # deliberately NOT a multiple of TB (tail handling)
TB = 128                  # batch tile (rows per grid step)
LANE = 128                # pad feature dims to multiples of this


def _round_up(x, m):
    return (x + m - 1) // m * m


# --------------------- CoefficientMappingModule.to_m -------------------------
def build_to_m(lmax: int, mmax: int):
    """Permutation matrix reordering (l, m) coefficients into m-major blocks,
    matching CoefficientMappingModule: [m=0 | m=1 real | m=1 imag | ...]."""
    m_complex = []
    for l in range(lmax + 1):
        mm = min(mmax, l)
        for m in range(-mm, mm + 1):
            m_complex.append(m)
    m_complex = np.asarray(m_complex)
    num_coef = m_complex.shape[0]
    to_m = np.zeros((num_coef, num_coef), dtype=np.float32)
    m_size = []
    offset = 0
    for m in range(mmax + 1):
        idx_r = np.nonzero(m_complex == m)[0]
        idx_i = np.nonzero(m_complex == -m)[0] if m > 0 else np.zeros((0,), np.int64)
        for row, col in enumerate(idx_r):
            to_m[offset + row, col] = 1.0
        offset += len(idx_r)
        m_size.append(int(len(idx_r)))
        for row, col in enumerate(idx_i):
            to_m[offset + row, col] = 1.0
        offset += len(idx_i)
    assert offset == num_coef
    return jnp.asarray(to_m), m_size


# ----------------------------- parameter init --------------------------------
def init_params(key, C, m_out, lmax, mmax):
    """Deterministic synthetic weights with the same shapes as the module:
       fc_m0: Linear((lmax+1)*C -> m_out*(lmax+1))       (with bias)
       so2_m_fc[m-1]: Linear((lmax-m+1)*C -> m_out*(lmax-m+1), bias=False)"""
    in0 = (lmax + 1) * C
    out0 = m_out * (lmax + 1)
    keys = jax.random.split(key, 2 + mmax)
    bound0 = 1.0 / np.sqrt(in0)
    params = {
        "w0": jax.random.uniform(keys[0], (out0, in0), jnp.float32, -bound0, bound0),
        "b0": jax.random.uniform(keys[1], (out0,), jnp.float32, -bound0, bound0),
        "wm": [],
    }
    for m in range(1, mmax + 1):
        in_m = (lmax - m + 1) * C
        out_m = m_out * (lmax - m + 1)
        bnd = 1.0 / np.sqrt(in_m)
        params["wm"].append(
            jax.random.uniform(keys[1 + m], (out_m, in_m), jnp.float32, -bnd, bnd)
        )
    return params


# ------------- fuse per-m blocks + fold permutations (trace time) ------------
def build_fused_weight(params, to_m, m_size, *, C, m_out, mmax, pad_to=LANE):
    """Return (wT_pad, b_pad, out_dim) such that
         y_flat = x_flat @ wT_pad + b_pad
       (with x_flat / y_flat in the ORIGINAL, un-permuted flattened layout)
       reproduces the whole SO2_Linear forward:
       to_m permutation -> block-diag {fc_m0, 2x so2_m_fc[m]} -> inverse to_m."""
    to_m_np = np.asarray(to_m)
    num_coef = to_m_np.shape[0]
    perm = np.argmax(to_m_np, axis=1)        # xp[:, b, :] = x[:, perm[b], :]
    pinv = np.argsort(perm)                  # inverse permutation

    # Block-diagonal weight / bias in the m-major (permuted) layout.
    B = np.zeros((num_coef * m_out, num_coef * C), np.float32)
    bias = np.zeros((num_coef * m_out,), np.float32)
    m0 = m_size[0]
    B[: m0 * m_out, : m0 * C] = np.asarray(params["w0"])
    bias[: m0 * m_out] = np.asarray(params["b0"])
    r, c = m0 * m_out, m0 * C
    for m in range(1, mmax + 1):
        ms = m_size[m]
        wm = np.asarray(params["wm"][m - 1])             # (ms*m_out, ms*C)
        for _ in range(2):                               # real / imag copies
            B[r: r + ms * m_out, c: c + ms * C] = wm
            r += ms * m_out
            c += ms * C

    # Fold output inverse-permutation into rows, input permutation into columns.
    row_idx = (pinv[:, None] * m_out + np.arange(m_out)[None, :]).reshape(-1)
    col_idx = (pinv[:, None] * C + np.arange(C)[None, :]).reshape(-1)
    W_eff = B[np.ix_(row_idx, col_idx)]                  # (num_coef*m_out, num_coef*C)
    b_eff = bias[row_idx]

    K = num_coef * C
    O = num_coef * m_out
    Kp = _round_up(K, pad_to)
    Op = _round_up(O, pad_to)
    W_pad = np.zeros((Op, Kp), np.float32)
    W_pad[:O, :K] = W_eff
    b_pad = np.zeros((1, Op), np.float32)
    b_pad[0, :O] = b_eff
    # Kernel computes x @ W.T, so pass the transposed, padded weight.
    return jnp.asarray(W_pad.T), jnp.asarray(b_pad), O


# ------------------------------ Pallas kernel --------------------------------
def _so2_fused_kernel(x_ref, w_ref, b_ref, o_ref):
    """x: (TB, Kp) bf16, w: (Kp, Op) bf16, b: (1, Op) f32 -> o: (TB, Op) f32.
    Single lane-dense MXU matmul with f32 accumulation + f32 bias add."""
    acc = jnp.dot(x_ref[...], w_ref[...], preferred_element_type=jnp.float32)
    o_ref[...] = (acc + b_ref[...]).astype(o_ref.dtype)


# ------------------------------ forward wrapper -------------------------------
def so2_linear_pallas(x, wT, b, out_dim, *, m_out, tb=TB):
    N, num_coef, C = x.shape
    K = num_coef * C
    Kp, Op = wT.shape

    # Flatten + bf16 cast + zero-pad batch/feature dims (fused into one XLA pass).
    x_flat = x.reshape(N, K).astype(jnp.bfloat16)
    n_tiles = pl.cdiv(N, tb)
    Npad = n_tiles * tb
    x_pad = jnp.pad(x_flat, ((0, Npad - N), (0, Kp - K)))
    wT_bf16 = wT.astype(jnp.bfloat16)

    out = pl.pallas_call(
        _so2_fused_kernel,
        grid=(n_tiles,),
        in_specs=[
            pl.BlockSpec((tb, Kp), lambda i: (i, 0)),
            # Constant-index blocks: DMA'd once, reused across all grid steps.
            pl.BlockSpec((Kp, Op), lambda i: (0, 0)),
            pl.BlockSpec((1, Op), lambda i: (0, 0)),
        ],
        out_specs=pl.BlockSpec((tb, Op), lambda i: (i, 0)),
        out_shape=jax.ShapeDtypeStruct((Npad, Op), jnp.float32),
        compiler_params=pltpu.CompilerParams(
            dimension_semantics=("parallel",),   # >=2 steps -> both v7x TCs busy
            vmem_limit_bytes=32 * 1024 * 1024,   # safe on v5e/v6e/v7x
        ),
    )(x_pad, wT_bf16, b)

    # Strip batch / feature padding, restore (N, num_coef, m_out) layout.
    return out[:N, :out_dim].reshape(N, num_coef, m_out)


# ------------------------------ pure-JAX reference ----------------------------
def so2_linear_ref(x, to_m, m_size, params, *, C, m_out, lmax, mmax):
    """Follows the PyTorch module structure exactly, all in f32."""
    N = x.shape[0]
    xp = jnp.einsum("nac,ba->nbc", x, to_m)
    x0 = xp[:, : m_size[0], :].reshape(N, -1)
    y0 = x0 @ params["w0"].T + params["b0"]
    outs = [y0.reshape(N, -1, m_out)]
    offset = m_size[0]
    for m in range(1, mmax + 1):
        ms = m_size[m]
        xm = xp[:, offset: offset + 2 * ms, :].reshape(N, 2, -1)
        ym = jnp.einsum("nkd,ed->nke", xm, params["wm"][m - 1])
        outs.append(ym.reshape(N, -1, m_out))
        offset += 2 * ms
    out = jnp.concatenate(outs, axis=1)
    return jnp.einsum("nac,ab->nbc", out, to_m)


# ----------------------------------- main -------------------------------------
if __name__ == "__main__":
    key = jax.random.PRNGKey(0)
    kx, kp = jax.random.split(key)

    to_m, m_size = build_to_m(LMAX, MMAX)
    num_coef = to_m.shape[0]          # = 9 for lmax=mmax=2

    x = jax.random.normal(kx, (BATCH, num_coef, SPHERE_CHANNELS), jnp.float32)
    params = init_params(kp, SPHERE_CHANNELS, M_OUTPUT_CHANNELS, LMAX, MMAX)

    wT, b, out_dim = build_fused_weight(
        params, to_m, m_size, C=SPHERE_CHANNELS, m_out=M_OUTPUT_CHANNELS, mmax=MMAX
    )

    out = so2_linear_pallas(x, wT, b, out_dim, m_out=M_OUTPUT_CHANNELS, tb=TB)
    out = jax.block_until_ready(out)

    ref = so2_linear_ref(
        x, to_m, m_size, params,
        C=SPHERE_CHANNELS, m_out=M_OUTPUT_CHANNELS, lmax=LMAX, mmax=MMAX,
    )

    assert out.shape == (BATCH, num_coef, M_OUTPUT_CHANNELS)
    # bf16 operands (f32 accumulation) vs f32 reference -> modest tolerance.
    np.testing.assert_allclose(np.asarray(out), np.asarray(ref), rtol=2e-2, atol=2e-2)
    print("KERNEL_OK")
</pallas_src>

<mosaic_0001>
module attributes {stable_mosaic.version = 11 : i64} {
  func.func @_so2_fused_kernel(%arg0: i32, %arg1: memref<128x256xbf16, #tpu.memory_space<vmem>>, %arg2: memref<256x256xbf16, #tpu.memory_space<vmem>>, %arg3: memref<1x256xf32, #tpu.memory_space<vmem>>, %arg4: memref<128x256xf32, #tpu.memory_space<vmem>>) attributes {dimension_semantics = [#tpu.dimension_semantics<parallel>], iteration_bounds = array<i64: 2>, scalar_prefetch = 0 : i64, scratch_operands = 0 : i64, tpu.core_type = #tpu.core_type<tc>, window_params = [{transform_indices = @transform_0, window_bounds = array<i64: 128, 256>}, {pipeline_mode = #tpu.pipeline_mode<synchronous>, transform_indices = @transform_1, window_bounds = array<i64: 256, 256>}, {pipeline_mode = #tpu.pipeline_mode<synchronous>, transform_indices = @transform_2, window_bounds = array<i64: 1, 256>}, {transform_indices = @transform_3, window_bounds = array<i64: 128, 256>}]} {
    %c0 = arith.constant 0 : index
    %c0_0 = arith.constant 0 : index
    %0 = vector.load %arg1[%c0, %c0_0] : memref<128x256xbf16, #tpu.memory_space<vmem>>, vector<128x256xbf16>
    %c0_1 = arith.constant 0 : index
    %c0_2 = arith.constant 0 : index
    %1 = vector.load %arg2[%c0_1, %c0_2] : memref<256x256xbf16, #tpu.memory_space<vmem>>, vector<256x256xbf16>
    %cst = arith.constant dense<0.000000e+00> : vector<128x256xf32>
    %2 = tpu.matmul %0, %1, %cst {dimension_numbers = #tpu.dot_dimension_numbers<[1], [0], [0], [1], [0, 0, 1, 1], [], []>} : vector<128x256xbf16>, vector<256x256xbf16>, vector<128x256xf32> -> vector<128x256xf32>
    %c0_3 = arith.constant 0 : index
    %c0_4 = arith.constant 0 : index
    %3 = vector.load %arg3[%c0_3, %c0_4] : memref<1x256xf32, #tpu.memory_space<vmem>>, vector<1x256xf32>
    %4 = vector.broadcast %3 : vector<1x256xf32> to vector<128x256xf32>
    %5 = arith.addf %2, %4 : vector<128x256xf32>
    %c0_5 = arith.constant 0 : index
    %c0_6 = arith.constant 0 : index
    %6 = vector.load %arg4[%c0_5, %c0_6] : memref<128x256xf32, #tpu.memory_space<vmem>>, vector<128x256xf32>
    tpu.vector_store %arg4[%c0_5, %c0_6], %5 {strides = array<i32>} : memref<128x256xf32, #tpu.memory_space<vmem>>, vector<128x256xf32>,
    return
  }
  func.func @transform_0(%arg0: i32) -> (i32, i32) {
    %c0_i32 = arith.constant 0 : i32
    %c0_i32_0 = arith.constant 0 : i32
    return %arg0, %c0_i32 : i32, i32
  }
  func.func @transform_1(%arg0: i32) -> (i32, i32) {
    %c0_i32 = arith.constant 0 : i32
    %c0_i32_0 = arith.constant 0 : i32
    %c0_i32_1 = arith.constant 0 : i32
    return %c0_i32, %c0_i32_0 : i32, i32
  }
  func.func @transform_2(%arg0: i32) -> (i32, i32) {
    %c0_i32 = arith.constant 0 : i32
    %c0_i32_0 = arith.constant 0 : i32
    %c0_i32_1 = arith.constant 0 : i32
    return %c0_i32, %c0_i32_0 : i32, i32
  }
  func.func @transform_3(%arg0: i32) -> (i32, i32) {
    %c0_i32 = arith.constant 0 : i32
    %c0_i32_0 = arith.constant 0 : i32
    return %arg0, %c0_i32 : i32, i32
  }
}

</mosaic_0001>

<bundles_post_ra>
// kernel: tpu_custom_call.1
= control target key start
LH: loop header
LB: loop body
LE: loop exit
PB: predicated region body
PF: predicated region fallthrough
CT: control target
= control target key end

     0   :  { %8 = vsyncpa [#allocation3], 0  ;;  %s1632_s0 = inlined_call_operand.hbm [shape: bf16[256,256], index: 0, kind: input, shape index: {}]   ;;  %s1633_s1 = inlined_call_operand.hbm [shape: bf16[256,256], index: 1, kind: input, shape index: {}]   ;;  %s1634_s2 = inlined_call_operand.hbm [shape: f32[1,256], index: 2, kind: input, shape index: {}]   ;;  %s1635_s3 = inlined_call_operand.hbm [shape: f32[256,256], index: 3, kind: output, shape index: {}]  }
   0x1   :  { %10 = vsyncpa [#allocation3 + $0x1], 0 }
   0x2   :  { %11 = vsyncpa [#allocation6], 0 }
   0x3   :  { %12 = vsyncpa [#allocation4], 0 }
   0x4   :  { %14 = vsyncpa [#allocation4 + $0x1], 0  ;;  %s1379_s12 = smov 0   ;;  %s1381_s13 = smov 0  }
   0x5   :  { %s1383_s14 = smov 0   ;;  %s1385_s15 = smov 0  }
   0x6 LB: > { %s1400_s16 = sadd.s32 4294967295, %s1351_s15   ;;  %s856_s17 = sadd.s32 4294967294, %s1351_s15   ;;  %s1351_s15 = sphi %s1385_s15, %s1645_s15   ;;  %s1347_s14 = sphi %s1383_s14, %s1644_s14   ;;  %s1343_s13 = sphi %s1381_s13, %s1643_s13   ;;  %s1339_s12 = sphi %s1379_s12, %s1642_s12  }
   0x7   : > { %p40_p0 = scmp.ne.s32.totalorder %s1343_s13, %s1339_s12  ;;  %p41_p1 = scmp.eq.s32.totalorder %s1400_s16, 0 }
   0x8   : > { %p106_p2 = scmp.eq.s32.totalorder %s1400_s16, 1  ;;  %p112_p3 = scmp.eq.s32.totalorder %s856_s17, 1 }
   0x9   : > { %p1409_p4 = por %p41_p1, %p40_p0  ;;  %p857_p5 = scmp.ge.s32.totalorder %s1351_s15, 1 }
   0xa   : > { %p1414_p6 = por %p112_p3, %p40_p0  ;;  %p119_p7 = scmp.lt.s32.totalorder %s1351_s15, 3 }
   0xb   : > { %s130_s22 = sshll.u32 %s1633_s1, 4  ;;  %s1353_s24 = smov [#allocation5]   ;;  %s131_s22 = int_to_ptr.hbm [resolvable:$true] %s130_s22 }
   0xc   : > { %p1422_p8 = pnand %p857_p5, %p119_p7  ;;  %s132_s25 = sshll.u32 %s1353_s24, 4  ;;  %s133_s25 = int_to_ptr.vmem [resolvable:$true] %s132_s25 }
   0xd   : > { %s145_s28 = sshll.u32 %s1634_s2, 4  ;;  %s1354_s29 = smov 128   ;;  %s146_s28 = int_to_ptr.hbm [resolvable:$true] %s145_s28 }
   0xe   : > { %p1132_p9 = pneg %p1422_p8  ;;  %s1355_s30 = smov 8  }
   0xf   : > { %s1356_s4 = smov [#allocation7]   ;;  %s1438_s6 = sadd.s32 1, %s1351_s15  }
  0x10   : > { %p1133_p10 = pnand %p1132_p9, %p41_p1  ;;  %s147_s5 = sshll.u32 %s1356_s4, 4  ;;  %s148_s5 = int_to_ptr.vmem [resolvable:$true] %s147_s5 }
  0x11   : > { %s27_s7 = sadd.s32 1, %s1347_s14  ;;  %s24_s8 = ssub.s32 %s1351_s15, %s1438_s6 }
  0x12   : > { %1135 = dma.hbm_to_vmem [thread:$0]  (!%p1133_p10), %s131_s22, 4096, %s133_s25, [#allocation6], %s1354_s29, %s1354_s29, %s1355_s30  }
  0x13   : > { %1138 = dma.hbm_to_vmem [thread:$0]  (!%p1133_p10), %s146_s28, 32, %s148_s5, [#allocation6]  }
  0x14   : > { %p34_p12 = scmp.ne.s32.totalorder %s1347_s14, %s1343_s13  ;;  %p25_p13 = scmp.eq.s32.totalorder %s24_s8, 0 }
  0x15   : > { %p35_p0 = scmp.eq.s32.totalorder %s1351_s15, 0  ;;  %p1149_p5 = scmp.lt.s32.totalorder %s1351_s15, 2 }
  0x16   : > { %p1448_p3 = por %p106_p2, %p34_p12  ;;  %s158_s11 = sand.u32 1, %s1347_s14  }
  0x17   : > { %s1454_s10 = scalar_select %p25_p13, %s1347_s14, %s27_s7  }
  0x18   : > { %p36_p7 = por %p35_p0, %p34_p12  ;;  %s861_s17 = sshll.u32 %s158_s11, 7 }
  0x19   : > { %s1069_s20 = sshll.u32 %s1351_s15, 7  ;;  %s162_s25 = scalar_lea.vmem [#allocation2], %s861_s17 }
  0x1a   : > { %s168_s24 = scalar_lea.hbm %s1632_s0, %s1069_s20  ;;  %s171_s26 = sshll.u32 %s162_s25, 4  ;;  %s172_s26 = int_to_ptr.vmem [resolvable:$true] %s171_s26 }
  0x1b   : > { %s169_s27 = sshll.u32 %s168_s24, 4  ;;  %p1461_p2 = pnand %p1149_p5, %p36_p7  ;;  %s170_s27 = int_to_ptr.hbm [resolvable:$true] %s169_s27 }
  0x1c   : > { %s159_s4 = scalar_lea.sflag [#allocation3], %s158_s11  ;;  %s1251_s5 = sshra.s32 %s170_s27, 4  ;;  %s1252_s5 = int_to_ptr.hbm [resolvable:$true] %s1251_s5 }
  0x1d   : > { %s1253_s7 = scalar_lea.hbm %s1252_s5, 128  ;;  %p1255_p10 = pneg %p1461_p2 }
  0x1e   : > { %p1254_p9 = scmp.ne.s32.totalorder %s1252_s5, %s1253_s7  ;;  %s1258_s20 = scalar_lea.hbm %s1632_s0, 256 }
  0x1f   : > { %p1259_p0 = scmp.lt.s32.totalorder %s1252_s5, %s1632_s0  ;;  %p1260_p5 = scmp.lt.s32.totalorder %s1258_s20, %s1253_s7 }
  0x20   : > { %p1256_p12 = pnand %p1255_p10, %p1254_p9 }
  0x21   : > { %p1261_p7 = por %p1260_p5, %p1259_p0 }
  0x22   : > { %p1257_p13 = pneg %p1256_p12 }
  0x24   : > { %p1262_p11 = pnand %p1261_p7, %p1257_p13 }
  0x26   : > { %1265 = shalt.err (!%p1262_p11)
}
  0x27   : > { %1142 = dma.hbm_to_vmem [thread:$0]  (!%p1461_p2), %s170_s27, 2048, %s172_s26, %s159_s4, %s1354_s29, %s1354_s29, %s1355_s30  }
  0x28   : > { %183 = sbr.rel (%p1422_p8) target bundleno = 344 (0x158), region = 32  ;;  %s1481_s11 = sand.u32 (!%p1422_p8), 1, %s1343_s13  }
  0x29   : > { %s866_s24 = sshll.u32 (!%p1422_p8), %s1481_s11, 7  ;;  %s186_s25 = scalar_lea.sflag (!%p1422_p8), [#allocation3], %s1481_s11 }
  0x2a   : > { %s1485_s5 = scalar_lea.vmem (!%p1422_p8), [#allocation2], %s866_s24 }
  0x2d   : > { %1326 = dma.done.wait (%p1409_p4), %s186_s25, 2048  }
  0x2e   : > { %1328 = vsyncadd (%p1409_p4), %s186_s25, 4294965248 }
  0x2f   : > { %1330 = dma.done.wait (%p41_p1), [#allocation6], 4128  }
  0x30   : > { %1332 = vsyncadd (%p41_p1), [#allocation6], 4294963168  ;;  %v992_v0 = vld [vmem:[#allocation5 + $0x70] sm:$0xf]  ;;  %v1101_v1 = vld [vmem:[#allocation5 + $0x74] sm:$0xf0] }
  0x31   : > { %v1056_v2 = vld [vmem:[#allocation5 + $0xf0] sm:$0xf]  ;;  %v993_v3 = vor.u32 %v1101_v1, %v992_v0  ;;  %v1117_v4 = vld [vmem:[#allocation5 + $0xf4] sm:$0xf0]  ;;  %v1100_v5 = vld [vmem:[#allocation5 + $0x74] sm:$0xf] }
  0x32   : > { %v994_v6 = vld [vmem:[#allocation5 + $0x78] sm:$0xf0]  ;;  %v1057_v7 = vor.u32 %v1117_v4, %v1056_v2  ;;  %v1116_v9 = vld [vmem:[#allocation5 + $0xf4] sm:$0xf]  ;;  %v984_v11 = vld [vmem:[#allocation5 + $0x60] sm:$0xf] }
  0x33   : > { %v997_v8 = vor.u32 %v1100_v5, %v994_v6  ;;  %v1058_v10 = vld [vmem:[#allocation5 + $0xf8] sm:$0xf0]  ;;  %519 = vmatpush.bf16.msra.mxu0 %v993_v3  ;;  %v1099_v13 = vld [vmem:[#allocation5 + $0x64] sm:$0xf0]  ;;  %v1048_v14 = vld [vmem:[#allocation5 + $0xe0] sm:$0xf] }
  0x34   : > { %v1061_v12 = vor.u32 %v1116_v9, %v1058_v10  ;;  %v1115_v15 = vld [vmem:[#allocation5 + $0xe4] sm:$0xf0]  ;;  %568 = vmatpush.bf16.msra.mxu1 %v1057_v7  ;;  %v985_v16 = vor.u32 %v1099_v13, %v984_v11  ;;  %v1098_v18 = vld [vmem:[#allocation5 + $0x64] sm:$0xf]  ;;  %v986_v19 = vld [vmem:[#allocation5 + $0x68] sm:$0xf0] }
  0x35   : > { %617 = vmatpush.bf16.msra.mxu2 %v997_v8  ;;  %v1049_v17 = vor.u32 %v1115_v15, %v1048_v14  ;;  %v1114_v20 = vld [vmem:[#allocation5 + $0xe4] sm:$0xf]  ;;  %v989_v21 = vor.u32 %v1098_v18, %v986_v19  ;;  %v1050_v22 = vld [vmem:[#allocation5 + $0xe8] sm:$0xf0]  ;;  %v976_v23 = vld [vmem:[#allocation5 + $0x50] sm:$0xf] }
  0x36   : > { %666 = vmatpush.bf16.msra.mxu3 %v1061_v12  ;;  %v1097_v24 = vld [vmem:[#allocation5 + $0x54] sm:$0xf0]  ;;  %v1053_v25 = vor.u32 %v1114_v20, %v1050_v22  ;;  %v1040_v26 = vld [vmem:[#allocation5 + $0xd0] sm:$0xf]  ;;  %v1096_v28 = vld [vmem:[#allocation5 + $0x54] sm:$0xf] }
  0x37   : > { %v1113_v27 = vld [vmem:[#allocation5 + $0xd4] sm:$0xf0]  ;;  %520 = vmatpush.bf16.msra.mxu0 %v985_v16  ;;  %v977_v29 = vor.u32 %v1097_v24, %v976_v23  ;;  %v978_v30 = vld [vmem:[#allocation5 + $0x58] sm:$0xf0]  ;;  %v1112_v31 = vld [vmem:[#allocation5 + $0xd4] sm:$0xf] }
  0x38   : > { %v1042_v32 = vld [vmem:[#allocation5 + $0xd8] sm:$0xf0]  ;;  %569 = vmatpush.bf16.msra.mxu1 %v1049_v17  ;;  %v1041_v33 = vor.u32 %v1113_v27, %v1040_v26  ;;  %v981_v34 = vor.u32 %v1096_v28, %v978_v30  ;;  %v968_v35 = vld [vmem:[#allocation5 + $0x40] sm:$0xf]  ;;  %v1095_v36 = vld [vmem:[#allocation5 + $0x44] sm:$0xf0] }
  0x39   : > { %618 = vmatpush.bf16.msra.mxu2 %v989_v21  ;;  %v1032_v37 = vld [vmem:[#allocation5 + $0xc0] sm:$0xf]  ;;  %v1045_v38 = vor.u32 %v1112_v31, %v1042_v32  ;;  %v1111_v39 = vld [vmem:[#allocation5 + $0xc4] sm:$0xf0]  ;;  %v1094_v40 = vld [vmem:[#allocation5 + $0x44] sm:$0xf]  ;;  %v969_v44 = vor.u32 %v1095_v36, %v968_v35 }
  0x3a   : > { %667 = vmatpush.bf16.msra.mxu3 %v1053_v25  ;;  %v970_v41 = vld [vmem:[#allocation5 + $0x48] sm:$0xf0]  ;;  %v1110_v42 = vld [vmem:[#allocation5 + $0xc4] sm:$0xf]  ;;  %v1033_v45 = vor.u32 %v1111_v39, %v1032_v37  ;;  %v960_v47 = vld [vmem:[#allocation5 + $0x30] sm:$0xf] }
  0x3b   : > { %v1034_v43 = vld [vmem:[#allocation5 + $0xc8] sm:$0xf0]  ;;  %521 = vmatpush.bf16.msra.mxu0 %v977_v29  ;;  %v973_v46 = vor.u32 %v1094_v40, %v970_v41  ;;  %v1093_v48 = vld [vmem:[#allocation5 + $0x34] sm:$0xf0]  ;;  %v1024_v49 = vld [vmem:[#allocation5 + $0xb0] sm:$0xf] }
  0x3c   : > { %570 = vmatpush.bf16.msra.mxu1 %v1041_v33  ;;  %v1037_v50 = vor.u32 %v1110_v42, %v1034_v43  ;;  %v1109_v51 = vld [vmem:[#allocation5 + $0xb4] sm:$0xf0]  ;;  %v1092_v52 = vld [vmem:[#allocation5 + $0x34] sm:$0xf]  ;;  %v962_v53 = vld [vmem:[#allocation5 + $0x38] sm:$0xf0]  ;;  %v961_v56 = vor.u32 %v1093_v48, %v960_v47 }
  0x3d   : > { %619 = vmatpush.bf16.msra.mxu2 %v981_v34  ;;  %v1108_v54 = vld [vmem:[#allocation5 + $0xb4] sm:$0xf]  ;;  %v1026_v55 = vld [vmem:[#allocation5 + $0xb8] sm:$0xf0]  ;;  %v1025_v57 = vor.u32 %v1109_v51, %v1024_v49  ;;  %v965_v58 = vor.u32 %v1092_v52, %v962_v53  ;;  %v952_v59 = vld [vmem:[#allocation5 + $0x20] sm:$0xf] }
  0x3e   : > { %668 = vmatpush.bf16.msra.mxu3 %v1045_v38  ;;  %v1091_v60 = vld [vmem:[#allocation5 + $0x24] sm:$0xf0]  ;;  %v1016_v61 = vld [vmem:[#allocation5 + $0xa0] sm:$0xf]  ;;  %v1029_v62 = vor.u32 %v1108_v54, %v1026_v55  ;;  %v1090_v0 = vld [vmem:[#allocation5 + $0x24] sm:$0xf] }
  0x3f   : > { %522 = vmatpush.bf16.msra.mxu0 %v969_v44  ;;  %v1107_v63 = vld [vmem:[#allocation5 + $0xa4] sm:$0xf0]  ;;  %v954_v1 = vld [vmem:[#allocation5 + $0x28] sm:$0xf0]  ;;  %v1106_v2 = vld [vmem:[#allocation5 + $0xa4] sm:$0xf]  ;;  %v953_v4 = vor.u32 %v1091_v60, %v952_v59 }
  0x40   : > { %571 = vmatpush.bf16.msra.mxu1 %v1033_v45  ;;  %v1018_v3 = vld [vmem:[#allocation5 + $0xa8] sm:$0xf0]  ;;  %v1017_v5 = vor.u32 %v1107_v63, %v1016_v61  ;;  %v957_v6 = vor.u32 %v1090_v0, %v954_v1  ;;  %v944_v7 = vld [vmem:[#allocation5 + $0x10] sm:$0xf]  ;;  %v1089_v8 = vld [vmem:[#allocation5 + $0x14] sm:$0xf0] }
  0x41   : > { %620 = vmatpush.bf16.msra.mxu2 %v973_v46  ;;  %v1008_v9 = vld [vmem:[#allocation5 + $0x90] sm:$0xf]  ;;  %v1021_v10 = vor.u32 %v1106_v2, %v1018_v3  ;;  %v1105_v11 = vld [vmem:[#allocation5 + $0x94] sm:$0xf0]  ;;  %v1088_v12 = vld [vmem:[#allocation5 + $0x14] sm:$0xf]  ;;  %v945_v16 = vor.u32 %v1089_v8, %v944_v7 }
  0x42   : > { %669 = vmatpush.bf16.msra.mxu3 %v1037_v50  ;;  %v946_v13 = vld [vmem:[#allocation5 + $0x18] sm:$0xf0]  ;;  %v1104_v14 = vld [vmem:[#allocation5 + $0x94] sm:$0xf]  ;;  %v1009_v17 = vor.u32 %v1105_v11, %v1008_v9  ;;  %v936_v19 = vld [vmem:[#allocation5] sm:$0xf] }
  0x43   : > { %523 = vmatpush.bf16.msra.mxu0 %v961_v56  ;;  %v1010_v15 = vld [vmem:[#allocation5 + $0x98] sm:$0xf0]  ;;  %v949_v18 = vor.u32 %v1088_v12, %v946_v13  ;;  %v1087_v20 = vld [vmem:[#allocation5 + $0x4] sm:$0xf0]  ;;  %v1000_v21 = vld [vmem:[#allocation5 + $0x80] sm:$0xf] }
  0x44   : > { %572 = vmatpush.bf16.msra.mxu1 %v1025_v57  ;;  %v1013_v22 = vor.u32 %v1104_v14, %v1010_v15  ;;  %v1103_v23 = vld [vmem:[#allocation5 + $0x84] sm:$0xf0]  ;;  %v1086_v24 = vld [vmem:[#allocation5 + $0x4] sm:$0xf]  ;;  %v938_v25 = vld [vmem:[#allocation5 + $0x8] sm:$0xf0]  ;;  %v937_v28 = vor.u32 %v1087_v20, %v936_v19 }
  0x45   : > { %621 = vmatpush.bf16.msra.mxu2 %v965_v58  ;;  %v1102_v26 = vld [vmem:[#allocation5 + $0x84] sm:$0xf]  ;;  %v1002_v27 = vld [vmem:[#allocation5 + $0x88] sm:$0xf0]  ;;  %v872_v29 = vld [vmem:[%s1485_s5] sm:$0xf]  ;;  %v1001_v31 = vor.u32 %v1103_v23, %v1000_v21  ;;  %v941_v32 = vor.u32 %v1086_v24, %v938_v25 }
  0x46   : > { %670 = vmatpush.bf16.msra.mxu3 %v1029_v62  ;;  %v1071_v30 = vld [vmem:[%s1485_s5 + $0x4] sm:$0xf0]  ;;  %v1070_v33 = vld [vmem:[%s1485_s5 + $0x4] sm:$0xf]  ;;  %v874_v34 = vld [vmem:[%s1485_s5 + $0x8] sm:$0xf0]  ;;  %v1005_v35 = vor.u32 %v1102_v26, %v1002_v27 }
  0x47   : > { %524 = vmatpush.bf16.msra.mxu0 %v953_v4  ;;  %v873_v36 = vor.u32 %v1071_v30, %v872_v29  ;;  %v877_v37 = vor.u32 %v1070_v33, %v874_v34  ;;  %v880_v38 = vld [vmem:[%s1485_s5 + $0x10] sm:$0xf]  ;;  %v1073_v39 = vld [vmem:[%s1485_s5 + $0x14] sm:$0xf0]  ;;  %v1072_v40 = vld [vmem:[%s1485_s5 + $0x14] sm:$0xf] }
  0x48   : > { %573 = vmatpush.bf16.msra.mxu1 %v1017_v5  ;;  %v882_v41 = vld [vmem:[%s1485_s5 + $0x18] sm:$0xf0]  ;;  %v881_v42 = vor.u32 %v1073_v39, %v880_v38  ;;  %v888_v44 = vld [vmem:[%s1485_s5 + $0x20] sm:$0xf]  ;;  %v1075_v45 = vld [vmem:[%s1485_s5 + $0x24] sm:$0xf0] }
  0x49   : > { %622 = vmatpush.bf16.msra.mxu2 %v957_v6  ;;  %v885_v43 = vor.u32 %v1072_v40, %v882_v41  ;;  %v1074_v46 = vld [vmem:[%s1485_s5 + $0x24] sm:$0xf]  ;;  %v890_v47 = vld [vmem:[%s1485_s5 + $0x28] sm:$0xf0]  ;;  %v889_v48 = vor.u32 %v1075_v45, %v888_v44  ;;  %v896_v50 = vld [vmem:[%s1485_s5 + $0x30] sm:$0xf] }
  0x4a   : > { %671 = vmatpush.bf16.msra.mxu3 %v1021_v10  ;;  %v893_v49 = vor.u32 %v1074_v46, %v890_v47  ;;  %v1077_v51 = vld [vmem:[%s1485_s5 + $0x34] sm:$0xf0]  ;;  %v1076_v52 = vld [vmem:[%s1485_s5 + $0x34] sm:$0xf]  ;;  %v898_v53 = vld [vmem:[%s1485_s5 + $0x38] sm:$0xf0] }
  0x4b   : > { %525 = vmatpush.bf16.msra.mxu0 %v945_v16  ;;  %v897_v54 = vor.u32 %v1077_v51, %v896_v50  ;;  %v901_v55 = vor.u32 %v1076_v52, %v898_v53  ;;  %v904_v56 = vld [vmem:[%s1485_s5 + $0x40] sm:$0xf]  ;;  %v1079_v57 = vld [vmem:[%s1485_s5 + $0x44] sm:$0xf0]  ;;  %v1078_v58 = vld [vmem:[%s1485_s5 + $0x44] sm:$0xf] }
  0x4c   : > { %574 = vmatpush.bf16.msra.mxu1 %v1009_v17  ;;  %v906_v59 = vld [vmem:[%s1485_s5 + $0x48] sm:$0xf0]  ;;  %v905_v60 = vor.u32 %v1079_v57, %v904_v56  ;;  %v912_v62 = vld [vmem:[%s1485_s5 + $0x50] sm:$0xf]  ;;  %v1081_v63 = vld [vmem:[%s1485_s5 + $0x54] sm:$0xf0] }
  0x4d   : > { %623 = vmatpush.bf16.msra.mxu2 %v949_v18  ;;  %v909_v61 = vor.u32 %v1078_v58, %v906_v59  ;;  %v1080_v0 = vld [vmem:[%s1485_s5 + $0x54] sm:$0xf]  ;;  %v914_v1 = vld [vmem:[%s1485_s5 + $0x58] sm:$0xf0]  ;;  %v913_v2 = vor.u32 %v1081_v63, %v912_v62  ;;  %v920_v4 = vld [vmem:[%s1485_s5 + $0x60] sm:$0xf] }
  0x4e   : > { %672 = vmatpush.bf16.msra.mxu3 %v1013_v22  ;;  %v917_v3 = vor.u32 %v1080_v0, %v914_v1  ;;  %v1083_v5 = vld [vmem:[%s1485_s5 + $0x64] sm:$0xf0]  ;;  %v1082_v6 = vld [vmem:[%s1485_s5 + $0x64] sm:$0xf]  ;;  %v922_v7 = vld [vmem:[%s1485_s5 + $0x68] sm:$0xf0] }
  0x4f   : > { %526 = vmatpush.bf16.msra.mxu0 %v937_v28  ;;  %v921_v8 = vor.u32 %v1083_v5, %v920_v4  ;;  %v925_v9 = vor.u32 %v1082_v6, %v922_v7  ;;  %v928_v10 = vld [vmem:[%s1485_s5 + $0x70] sm:$0xf]  ;;  %v1085_v11 = vld [vmem:[%s1485_s5 + $0x74] sm:$0xf0]  ;;  %v1084_v12 = vld [vmem:[%s1485_s5 + $0x74] sm:$0xf] }
  0x50   : > { %575 = vmatpush.bf16.msra.mxu1 %v1001_v31  ;;  %v930_v13 = vld [vmem:[%s1485_s5 + $0x78] sm:$0xf0]  ;;  %v929_v14 = vor.u32 %v1085_v11, %v928_v10  ;;  %v273_v16 = vld [vmem:[#allocation7] sm:$0x3]  ;;  %s869_s18 = sshll.u32 %s1481_s11, 8  ;;  %s1119_s29 = sshll.u32 %s1400_s16, 8 }
  0x51   : > { %624 = vmatpush.bf16.msra.mxu2 %v941_v32  ;;  %v933_v15 = vor.u32 %v1084_v12, %v930_v13  ;;  %v1527_v17 = vperm.slane %v273_v16, 0  ;;  %v1531_v22 = vperm.slane %v273_v16, 1  ;;  %s1533_s23 = scalar_lea.vmem [#allocation8], %s869_s18  ;;  %s760_s27 = scalar_lea.hbm %s1635_s3, %s1119_s29 }
  0x52   : > { %673 = vmatpush.bf16.msra.mxu3 %v1005_v35  ;;  %527 = vmatmul.bf16.vlgmr.msra.gmra.mxu0 %v873_v36  ;;  %s761_s28 = sshll.u32 %s1533_s23, 4  ;;  %s763_s4 = sshll.u32 %s760_s27, 4  ;;  %s762_s28 = int_to_ptr.vmem [resolvable:$true] %s761_s28  ;;  %s764_s4 = int_to_ptr.hbm [resolvable:$true] %s763_s4 }
  0x53   : > { %576 = vmatmul.bf16.vlgmr.msra.gmra.mxu1 %v877_v37  ;;  %s748_s16 = scalar_lea.sflag [#allocation4], %s1481_s11  ;;  %s1295_s7 = sshra.s32 %s764_s4, 4  ;;  %s1296_s7 = int_to_ptr.hbm [resolvable:$true] %s1295_s7 }
  0x54   : > { %625 = vmatmul.bf16.vlgmr.msra.gmra.mxu2 %v873_v36  ;;  %s1297_s8 = scalar_lea.hbm %s1296_s7, 256  ;;  %s1301_s21 = scalar_lea.hbm %s1635_s3, 512 }
  0x55   : > { %674 = vmatmul.bf16.vlgmr.msra.gmra.mxu3 %v877_v37  ;;  %p1298_p1 = scmp.ne.s32.totalorder %s1296_s7, %s1297_s8  ;;  %p1302_p11 = scmp.lt.s32.totalorder %s1296_s7, %s1635_s3 }
  0x56   : > { %p1303_p2 = scmp.lt.s32.totalorder %s1301_s21, %s1297_s8 }
  0x57   : > { %p1299_p4 = pnand %p1298_p1, %p1448_p3 }
  0x58   : > { %p1304_p9 = por %p1303_p2, %p1302_p11 }
  0x59   : > { %p1300_p8 = pneg %p1299_p4 }
  0x5b   : > { %p1305_p10 = pnand %p1304_p9, %p1300_p8 }
  0x62   : > { %532 = vmatmul.bf16.gmra.mxu0 %v881_v42 }
  0x63   : > { %581 = vmatmul.bf16.gmra.mxu1 %v885_v43 }
  0x64   : > { %630 = vmatmul.bf16.gmra.mxu2 %v881_v42 }
  0x65   : > { %679 = vmatmul.bf16.gmra.mxu3 %v885_v43 }
  0x72   : > { %537 = vmatmul.bf16.gmra.mxu0 %v889_v48 }
  0x73   : > { %586 = vmatmul.bf16.gmra.mxu1 %v893_v49 }
  0x74   : > { %635 = vmatmul.bf16.gmra.mxu2 %v889_v48 }
  0x75   : > { %684 = vmatmul.bf16.gmra.mxu3 %v893_v49 }
  0x82   : > { %542 = vmatmul.bf16.gmra.mxu0 %v897_v54 }
  0x83   : > { %591 = vmatmul.bf16.gmra.mxu1 %v901_v55 }
  0x84   : > { %640 = vmatmul.bf16.gmra.mxu2 %v897_v54 }
  0x85   : > { %689 = vmatmul.bf16.gmra.mxu3 %v901_v55 }
  0x92   : > { %547 = vmatmul.bf16.gmra.mxu0 %v905_v60 }
  0x93   : > { %596 = vmatmul.bf16.gmra.mxu1 %v909_v61 }
  0x94   : > { %645 = vmatmul.bf16.gmra.mxu2 %v905_v60 }
  0x95   : > { %694 = vmatmul.bf16.gmra.mxu3 %v909_v61 }
  0xa2   : > { %552 = vmatmul.bf16.gmra.mxu0 %v913_v2 }
  0xa3   : > { %601 = vmatmul.bf16.gmra.mxu1 %v917_v3 }
  0xa4   : > { %650 = vmatmul.bf16.gmra.mxu2 %v913_v2 }
  0xa5   : > { %699 = vmatmul.bf16.gmra.mxu3 %v917_v3 }
  0xb2   : > { %557 = vmatmul.bf16.gmra.mxu0 %v921_v8 }
  0xb3   : > { %606 = vmatmul.bf16.gmra.mxu1 %v925_v9 }
  0xb4   : > { %655 = vmatmul.bf16.gmra.mxu2 %v921_v8 }
  0xb5   : > { %704 = vmatmul.bf16.gmra.mxu3 %v925_v9 }
  0xc2   : > { %562 = vmatmul.bf16.gmra.mxu0 %v929_v14 }
  0xc3   : > { %611 = vmatmul.bf16.gmra.mxu1 %v933_v15 }
  0xc4   : > { %660 = vmatmul.bf16.gmra.mxu2 %v929_v14 }
  0xc5   : > { %709 = vmatmul.bf16.gmra.mxu3 %v933_v15 }
  0xcf   : > { %v528_v18 = vpop.f32.mrf.mxu0 }
  0xd0   : > { %v529_v19 = vadd.f32 %v528_v18, %v1527_v17  ;;  %v577_v20 = vpop.f32.mrf.mxu1 }
  0xd2   : > { %v578_v21 = vadd.f32 %v577_v20, %v529_v19 }
  0xd4   : > { %715 = vst [vmem:[%s1533_s23] sm:$0xff] %v578_v21 }
  0xd7   : > { %v626_v23 = vpop.f32.mrf.mxu2  ;;  %v530_v26 = vpop.f32.mrf.mxu0 }
  0xd8   : > { %v627_v24 = vadd.f32 %v626_v23, %v1531_v22  ;;  %v675_v25 = vpop.f32.mrf.mxu3  ;;  %v531_v27 = vadd.f32 %v530_v26, %v1527_v17  ;;  %v579_v28 = vpop.f32.mrf.mxu1 }
  0xda   : > { %v676_v29 = vadd.f32 %v675_v25, %v627_v24  ;;  %v580_v30 = vadd.f32 %v579_v28, %v531_v27 }
  0xdc   : > { %716 = vst [vmem:[%s1533_s23 + $0x8] sm:$0xff] %v676_v29 }
  0xdd   : > { %717 = vst [vmem:[%s1533_s23 + $0x10] sm:$0xff] %v580_v30 }
  0xdf   : > { %v628_v31 = vpop.f32.mrf.mxu2  ;;  %v533_v34 = vpop.f32.mrf.mxu0 }
  0xe0   : > { %v629_v32 = vadd.f32 %v628_v31, %v1531_v22  ;;  %v677_v33 = vpop.f32.mrf.mxu3  ;;  %v534_v35 = vadd.f32 %v533_v34, %v1527_v17  ;;  %v582_v36 = vpop.f32.mrf.mxu1 }
  0xe2   : > { %v678_v37 = vadd.f32 %v677_v33, %v629_v32  ;;  %v583_v38 = vadd.f32 %v582_v36, %v534_v35 }
  0xe4   : > { %718 = vst [vmem:[%s1533_s23 + $0x18] sm:$0xff] %v678_v37 }
  0xe5   : > { %719 = vst [vmem:[%s1533_s23 + $0x20] sm:$0xff] %v583_v38 }
  0xe7   : > { %v631_v39 = vpop.f32.mrf.mxu2  ;;  %v535_v42 = vpop.f32.mrf.mxu0 }
  0xe8   : > { %v632_v40 = vadd.f32 %v631_v39, %v1531_v22  ;;  %v680_v41 = vpop.f32.mrf.mxu3  ;;  %v536_v43 = vadd.f32 %v535_v42, %v1527_v17  ;;  %v584_v44 = vpop.f32.mrf.mxu1 }
  0xea   : > { %v681_v45 = vadd.f32 %v680_v41, %v632_v40  ;;  %v585_v46 = vadd.f32 %v584_v44, %v536_v43 }
  0xec   : > { %720 = vst [vmem:[%s1533_s23 + $0x28] sm:$0xff] %v681_v45 }
  0xed   : > { %721 = vst [vmem:[%s1533_s23 + $0x30] sm:$0xff] %v585_v46 }
  0xef   : > { %v633_v47 = vpop.f32.mrf.mxu2  ;;  %v538_v50 = vpop.f32.mrf.mxu0 }
  0xf0   : > { %v634_v48 = vadd.f32 %v633_v47, %v1531_v22  ;;  %v682_v49 = vpop.f32.mrf.mxu3  ;;  %v539_v51 = vadd.f32 %v538_v50, %v1527_v17  ;;  %v587_v52 = vpop.f32.mrf.mxu1 }
  0xf2   : > { %v683_v53 = vadd.f32 %v682_v49, %v634_v48  ;;  %v588_v54 = vadd.f32 %v587_v52, %v539_v51 }
  0xf4   : > { %722 = vst [vmem:[%s1533_s23 + $0x38] sm:$0xff] %v683_v53 }
  0xf5   : > { %723 = vst [vmem:[%s1533_s23 + $0x40] sm:$0xff] %v588_v54 }
  0xf7   : > { %v636_v55 = vpop.f32.mrf.mxu2  ;;  %v540_v58 = vpop.f32.mrf.mxu0 }
  0xf8   : > { %v637_v56 = vadd.f32 %v636_v55, %v1531_v22  ;;  %v685_v57 = vpop.f32.mrf.mxu3  ;;  %v541_v59 = vadd.f32 %v540_v58, %v1527_v17  ;;  %v589_v60 = vpop.f32.mrf.mxu1 }
  0xfa   : > { %v686_v61 = vadd.f32 %v685_v57, %v637_v56  ;;  %v590_v62 = vadd.f32 %v589_v60, %v541_v59 }
  0xfc   : > { %724 = vst [vmem:[%s1533_s23 + $0x48] sm:$0xff] %v686_v61 }
  0xfd   : > { %725 = vst [vmem:[%s1533_s23 + $0x50] sm:$0xff] %v590_v62 }
  0xff   : > { %v638_v63 = vpop.f32.mrf.mxu2  ;;  %v543_v2 = vpop.f32.mrf.mxu0 }
 0x100   : > { %v639_v0 = vadd.f32 %v638_v63, %v1531_v22  ;;  %v687_v1 = vpop.f32.mrf.mxu3  ;;  %v544_v3 = vadd.f32 %v543_v2, %v1527_v17  ;;  %v592_v4 = vpop.f32.mrf.mxu1 }
 0x102   : > { %v688_v5 = vadd.f32 %v687_v1, %v639_v0  ;;  %v593_v6 = vadd.f32 %v592_v4, %v544_v3 }
 0x104   : > { %726 = vst [vmem:[%s1533_s23 + $0x58] sm:$0xff] %v688_v5 }
 0x105   : > { %727 = vst [vmem:[%s1533_s23 + $0x60] sm:$0xff] %v593_v6 }
 0x107   : > { %v641_v7 = vpop.f32.mrf.mxu2  ;;  %v545_v10 = vpop.f32.mrf.mxu0 }
 0x108   : > { %v642_v8 = vadd.f32 %v641_v7, %v1531_v22  ;;  %v690_v9 = vpop.f32.mrf.mxu3  ;;  %v546_v11 = vadd.f32 %v545_v10, %v1527_v17  ;;  %v594_v12 = vpop.f32.mrf.mxu1 }
 0x10a   : > { %v691_v13 = vadd.f32 %v690_v9, %v642_v8  ;;  %v595_v14 = vadd.f32 %v594_v12, %v546_v11 }
 0x10c   : > { %728 = vst [vmem:[%s1533_s23 + $0x68] sm:$0xff] %v691_v13 }
 0x10d   : > { %729 = vst [vmem:[%s1533_s23 + $0x70] sm:$0xff] %v595_v14 }
 0x10f   : > { %v643_v15 = vpop.f32.mrf.mxu2  ;;  %v548_v19 = vpop.f32.mrf.mxu0 }
 0x110   : > { %v644_v16 = vadd.f32 %v643_v15, %v1531_v22  ;;  %v692_v18 = vpop.f32.mrf.mxu3  ;;  %v549_v20 = vadd.f32 %v548_v19, %v1527_v17  ;;  %v597_v21 = vpop.f32.mrf.mxu1 }
 0x112   : > { %v693_v23 = vadd.f32 %v692_v18, %v644_v16  ;;  %v598_v24 = vadd.f32 %v597_v21, %v549_v20 }
 0x114   : > { %730 = vst [vmem:[%s1533_s23 + $0x78] sm:$0xff] %v693_v23 }
 0x115   : > { %731 = vst [vmem:[%s1533_s23 + $0x80] sm:$0xff] %v598_v24 }
 0x117   : > { %v646_v25 = vpop.f32.mrf.mxu2  ;;  %v550_v28 = vpop.f32.mrf.mxu0 }
 0x118   : > { %v647_v26 = vadd.f32 %v646_v25, %v1531_v22  ;;  %v695_v27 = vpop.f32.mrf.mxu3  ;;  %v551_v29 = vadd.f32 %v550_v28, %v1527_v17  ;;  %v599_v30 = vpop.f32.mrf.mxu1 }
 0x11a   : > { %v696_v31 = vadd.f32 %v695_v27, %v647_v26  ;;  %v600_v32 = vadd.f32 %v599_v30, %v551_v29 }
 0x11c   : > { %732 = vst [vmem:[%s1533_s23 + $0x88] sm:$0xff] %v696_v31 }
 0x11d   : > { %733 = vst [vmem:[%s1533_s23 + $0x90] sm:$0xff] %v600_v32 }
 0x11f   : > { %v648_v33 = vpop.f32.mrf.mxu2  ;;  %v553_v36 = vpop.f32.mrf.mxu0 }
 0x120   : > { %v649_v34 = vadd.f32 %v648_v33, %v1531_v22  ;;  %v697_v35 = vpop.f32.mrf.mxu3  ;;  %v554_v37 = vadd.f32 %v553_v36, %v1527_v17  ;;  %v602_v38 = vpop.f32.mrf.mxu1 }
 0x122   : > { %v698_v39 = vadd.f32 %v697_v35, %v649_v34  ;;  %v603_v40 = vadd.f32 %v602_v38, %v554_v37 }
 0x124   : > { %734 = vst [vmem:[%s1533_s23 + $0x98] sm:$0xff] %v698_v39 }
 0x125   : > { %735 = vst [vmem:[%s1533_s23 + $0xa0] sm:$0xff] %v603_v40 }
 0x127   : > { %v651_v41 = vpop.f32.mrf.mxu2  ;;  %v555_v44 = vpop.f32.mrf.mxu0 }
 0x128   : > { %v652_v42 = vadd.f32 %v651_v41, %v1531_v22  ;;  %v700_v43 = vpop.f32.mrf.mxu3  ;;  %v556_v45 = vadd.f32 %v555_v44, %v1527_v17  ;;  %v604_v46 = vpop.f32.mrf.mxu1 }
 0x12a   : > { %v701_v47 = vadd.f32 %v700_v43, %v652_v42  ;;  %v605_v48 = vadd.f32 %v604_v46, %v556_v45 }
 0x12c   : > { %736 = vst [vmem:[%s1533_s23 + $0xa8] sm:$0xff] %v701_v47 }
 0x12d   : > { %737 = vst [vmem:[%s1533_s23 + $0xb0] sm:$0xff] %v605_v48 }
 0x12f   : > { %v653_v49 = vpop.f32.mrf.mxu2  ;;  %v558_v52 = vpop.f32.mrf.mxu0 }
 0x130   : > { %v654_v50 = vadd.f32 %v653_v49, %v1531_v22  ;;  %v702_v51 = vpop.f32.mrf.mxu3  ;;  %v559_v53 = vadd.f32 %v558_v52, %v1527_v17  ;;  %v607_v54 = vpop.f32.mrf.mxu1 }
 0x132   : > { %v703_v55 = vadd.f32 %v702_v51, %v654_v50  ;;  %v608_v56 = vadd.f32 %v607_v54, %v559_v53 }
 0x134   : > { %738 = vst [vmem:[%s1533_s23 + $0xb8] sm:$0xff] %v703_v55 }
 0x135   : > { %739 = vst [vmem:[%s1533_s23 + $0xc0] sm:$0xff] %v608_v56 }
 0x137   : > { %v656_v57 = vpop.f32.mrf.mxu2  ;;  %v560_v60 = vpop.f32.mrf.mxu0 }
 0x138   : > { %v657_v58 = vadd.f32 %v656_v57, %v1531_v22  ;;  %v705_v59 = vpop.f32.mrf.mxu3  ;;  %v561_v61 = vadd.f32 %v560_v60, %v1527_v17  ;;  %v609_v62 = vpop.f32.mrf.mxu1 }
 0x13a   : > { %v706_v63 = vadd.f32 %v705_v59, %v657_v58  ;;  %v610_v0 = vadd.f32 %v609_v62, %v561_v61 }
 0x13c   : > { %740 = vst [vmem:[%s1533_s23 + $0xc8] sm:$0xff] %v706_v63 }
 0x13d   : > { %741 = vst [vmem:[%s1533_s23 + $0xd0] sm:$0xff] %v610_v0 }
 0x13f   : > { %v658_v1 = vpop.f32.mrf.mxu2  ;;  %v563_v4 = vpop.f32.mrf.mxu0 }
 0x140   : > { %v659_v2 = vadd.f32 %v658_v1, %v1531_v22  ;;  %v707_v3 = vpop.f32.mrf.mxu3  ;;  %v564_v5 = vadd.f32 %v563_v4, %v1527_v17  ;;  %v612_v6 = vpop.f32.mrf.mxu1 }
 0x142   : > { %v708_v7 = vadd.f32 %v707_v3, %v659_v2  ;;  %v613_v8 = vadd.f32 %v612_v6, %v564_v5 }
 0x144   : > { %742 = vst [vmem:[%s1533_s23 + $0xd8] sm:$0xff] %v708_v7 }
 0x145   : > { %743 = vst [vmem:[%s1533_s23 + $0xe0] sm:$0xff] %v613_v8 }
 0x147   : > { %v661_v9 = vpop.f32.mrf.mxu2  ;;  %v565_v12 = vpop.f32.mrf.mxu0 }
 0x148   : > { %v662_v10 = vadd.f32 %v661_v9, %v1531_v22  ;;  %v710_v11 = vpop.f32.mrf.mxu3  ;;  %v566_v13 = vadd.f32 %v565_v12, %v1527_v17  ;;  %v614_v15 = vpop.f32.mrf.mxu1 }
 0x14a   : > { %v711_v14 = vadd.f32 %v710_v11, %v662_v10  ;;  %v615_v16 = vadd.f32 %v614_v15, %v566_v13 }
 0x14c   : > { %744 = vst [vmem:[%s1533_s23 + $0xe8] sm:$0xff] %v711_v14 }
 0x14d   : > { %745 = vst [vmem:[%s1533_s23 + $0xf0] sm:$0xff] %v615_v16 }
 0x14f   : > { %v663_v18 = vpop.f32.mrf.mxu2 }
 0x150   : > { %v664_v19 = vadd.f32 %v663_v18, %v1531_v22  ;;  %v712_v20 = vpop.f32.mrf.mxu3 }
 0x152   : > { %v713_v17 = vadd.f32 %v712_v20, %v664_v19 }
 0x154   : > { %746 = vst [vmem:[%s1533_s23 + $0xf8] sm:$0xff] %v713_v17 }
 0x155   : > { %1308 = shalt.err (!%p1305_p10)
}
 0x156   : > { %s1357_s11 = smov 256   ;;  %s1358_s25 = smov 16  }
 0x157   : > { %1130 = dma.vmem_to_hbm [thread:$0]  (%p1448_p3), %s762_s28, 4096, %s764_s4, %s748_s16, %s1357_s11, %s1357_s11, %s1358_s25  }
 0x158 PF: > { %s778_s5 = sand.u32 1, %s1339_s12   ;;  %p1641_p12 = scmp.ge.s32.totalorder %s1351_s15, 2 }
 0x159   : > { %s779_s18 = scalar_lea.sflag [#allocation4], %s778_s5 }
 0x15a   : > { %p1144_p13 = pnand %p1641_p12, %p1414_p6 }
 0x15c   : > { %p1145_p0 = pneg %p1144_p13 }
 0x15e   : > { %1334 = dma.done.wait (%p1145_p0), %s779_s18, 4096  }
 0x15f   : > { %1336 = vsyncadd (%p1145_p0), %s779_s18, 4294963200  ;;  %p17_p5 = scmp.ge.s32.totalorder %s1438_s6, 4   ;;  %s1642_s12 = smov %s1343_s13 }
 0x160   : > { %s1643_s13 = smov %s1347_s14  ;;  %s1644_s14 = smov %s1454_s10 }
 0x161   : > { %s1645_s15 = smov %s1438_s6  ;;  %19 = sbr.rel (!%p17_p5) target bundleno = 6 (0x6), region = 85 }
 0x166   :  { %785 = vsyncpa [#allocation3], 1 }
 0x167   :  { %787 = vsyncpa [#allocation3 + $0x1], 1 }
 0x168   :  { %788 = vsyncpa [#allocation6], 1 }
 0x169   :  { %789 = vsyncpa [#allocation4], 1 }
 0x16a   :  { %791 = vsyncpa [#allocation4 + $0x1], 1 }

</bundles_post_ra>
